<compile_context>
chip_gen: v7x
topology: tpu7x:2x2x1
jax: 0.10.0
libtpu: 0.0.40
codegen_flags: <defaults>
</compile_context>

<pallas_src>
import functools

import jax
import jax.numpy as jnp
from jax.experimental import pallas as pl
from jax.experimental.pallas import tpu as pltpu


def _round_up(n, m):
    return (n + m - 1) // m * m


def combined_kernel(x_ref, eps_ref,
                    we1_ref, be1_ref,          # encoder layer 1
                    wml_ref, bml_ref,          # fused [mu | logvar] head
                    wm1_ref, bm1_ref,          # mlp layer 1
                    wm2_ref, bm2_ref,          # mlp layer 2 (out dim padded to 128-multiple)
                    out_ref):
    Z = eps_ref.shape[-1]

    x = x_ref[...]                                                   # (TB, L) f32

    # --- VAE encoder ---
    h1 = jnp.dot(x.astype(jnp.bfloat16), we1_ref[...],
                 preferred_element_type=jnp.float32) + be1_ref[...]
    h1 = jnp.maximum(h1, 0.0)                                        # ReLU (f32 VPU)

    ml = jnp.dot(h1.astype(jnp.bfloat16), wml_ref[...],
                 preferred_element_type=jnp.float32) + bml_ref[...]  # (TB, 2Z)
    mean = ml[:, :Z]
    logvar = ml[:, Z:]

    # --- reparameterize: z = mean + eps * exp(0.5 * logvar) ---
    std = jnp.exp(0.5 * logvar)                                      # EUP transcendental, f32
    z = mean + eps_ref[...] * std

    # --- MLP head ---
    h2 = jnp.dot(z.astype(jnp.bfloat16), wm1_ref[...],
                 preferred_element_type=jnp.float32) + bm1_ref[...]
    h2 = jnp.maximum(h2, 0.0)
    out = jnp.dot(h2.astype(jnp.bfloat16), wm2_ref[...],
                  preferred_element_type=jnp.float32) + bm2_ref[...]  # (TB, D_out_padded)

    out_ref[...] = out.astype(out_ref.dtype)                         # lane-dense full vst


def combined_forward(x, eps, params, *, tile_b=256):
    """x: (B, L) f32 ; eps: (B, Z) f32 standard-normal noise -> (B, D_out) f32.

    (The torch unsqueeze(1) followed by the encoder's flatten is an identity
    on the data layout, so the kernel consumes x as (B, L) directly.)
    """
    B, L = x.shape
    Z = eps.shape[1]
    H_enc = params["we1"].shape[1]
    H_mlp = params["wm1"].shape[1]
    D_pad = params["wm2"].shape[1]          # 128-multiple padded output width
    D_out = params["d_out"]                 # true output width

    # Batch tiling: MXU-sized tiles, minimal zero-padding for small demo batches.
    tile_b = min(tile_b, _round_up(B, 8))
    B_pad = _round_up(B, tile_b)
    if B_pad != B:
        x = jnp.pad(x, ((0, B_pad - B), (0, 0)))
        eps = jnp.pad(eps, ((0, B_pad - B), (0, 0)))

    # Weights/biases: constant block index -> resident across the batch grid.
    full = lambda shape: pl.BlockSpec(shape, lambda i: (0, 0))

    out_padded = pl.pallas_call(
        combined_kernel,
        out_shape=jax.ShapeDtypeStruct((B_pad, D_pad), jnp.float32),
        grid=(B_pad // tile_b,),
        in_specs=[
            pl.BlockSpec((tile_b, L), lambda i: (i, 0)),     # x
            pl.BlockSpec((tile_b, Z), lambda i: (i, 0)),     # eps
            full((L, H_enc)), full((1, H_enc)),              # encoder layer 1
            full((H_enc, 2 * Z)), full((1, 2 * Z)),          # fused mu|logvar head
            full((Z, H_mlp)), full((1, H_mlp)),              # mlp layer 1
            full((H_mlp, D_pad)), full((1, D_pad)),          # mlp layer 2 (padded)
        ],
        out_specs=pl.BlockSpec((tile_b, D_pad), lambda i: (i, 0)),
        compiler_params=pltpu.CompilerParams(
            dimension_semantics=("parallel",)),
    )(x, eps,
      params["we1"], params["be1"],
      params["wml"], params["bml"],
      params["wm1"], params["bm1"],
      params["wm2"], params["bm2"])

    return out_padded[:B, :D_out]


def init_params(key, L, H_enc, Z, H_mlp, D_out):
    """Synthesized VAE-encoder + MLP-head weights (submodules not given).

    Layout: (in_features, out_features) so the kernel computes x @ W + b.
    mu / logvar heads are pre-concatenated; the final layer is pre-padded to a
    128-multiple output width (done ONCE here, never per call).
    """
    ks = jax.random.split(key, 5)
    scale = 0.1
    D_pad = _round_up(D_out, 128)

    wmu = scale * jax.random.normal(ks[1], (H_enc, Z), jnp.float32)
    wlv = scale * jax.random.normal(ks[2], (H_enc, Z), jnp.float32)
    wm2 = scale * jax.random.normal(ks[4], (H_mlp, D_out), jnp.float32)

    return {
        "we1": (scale * jax.random.normal(ks[0], (L, H_enc), jnp.float32)
                ).astype(jnp.bfloat16),
        "be1": jnp.zeros((1, H_enc), jnp.float32),
        "wml": jnp.concatenate([wmu, wlv], axis=1).astype(jnp.bfloat16),   # (H_enc, 2Z)
        "bml": jnp.zeros((1, 2 * Z), jnp.float32),
        "wm1": (scale * jax.random.normal(ks[3], (Z, H_mlp), jnp.float32)
                ).astype(jnp.bfloat16),
        "bm1": jnp.zeros((1, H_mlp), jnp.float32),
        "wm2": jnp.pad(wm2, ((0, 0), (0, D_pad - D_out))).astype(jnp.bfloat16),
        "bm2": jnp.zeros((1, D_pad), jnp.float32),
        "d_out": D_out,
    }


def _reference(x, eps, params):
    """Pure-JAX reference of the same forward math (bf16 weights, f32 accum)."""
    D_out = params["d_out"]
    f32 = jnp.float32
    h1 = jnp.maximum(
        jnp.dot(x.astype(jnp.bfloat16), params["we1"], preferred_element_type=f32)
        + params["be1"], 0.0)
    ml = jnp.dot(h1.astype(jnp.bfloat16), params["wml"], preferred_element_type=f32) \
        + params["bml"]
    Z = ml.shape[1] // 2
    mean, logvar = ml[:, :Z], ml[:, Z:]
    z = mean + eps * jnp.exp(0.5 * logvar)
    h2 = jnp.maximum(
        jnp.dot(z.astype(jnp.bfloat16), params["wm1"], preferred_element_type=f32)
        + params["bm1"], 0.0)
    out = jnp.dot(h2.astype(jnp.bfloat16), params["wm2"], preferred_element_type=f32) \
        + params["bm2"]
    return out[:, :D_out]


if __name__ == "__main__":
    # Small, forward-consistent shapes:
    #   x: (B, L) signal -> unsqueeze(1) -> (B, 1, L) -> encoder flatten -> (B, L)
    B, L = 4, 16          # batch, input length
    H_enc, Z = 32, 8      # encoder hidden width, latent dim
    H_mlp, D_out = 32, 4  # mlp hidden width, number of predicted parameters

    key = jax.random.PRNGKey(0)
    k_x, k_eps, k_p = jax.random.split(key, 3)

    x = jax.random.normal(k_x, (B, L), jnp.float32)
    # TODO(synk): torch draws fresh randn noise per call inside reparameterize;
    # here eps is supplied externally with a fixed seed for determinism.
    eps = jax.random.normal(k_eps, (B, Z), jnp.float32)
    params = init_params(k_p, L, H_enc, Z, H_mlp, D_out)

    out = combined_forward(x, eps, params)
    out = jax.block_until_ready(out)
    assert out.shape == (B, D_out)

    ref = _reference(x, eps, params)
    assert jnp.allclose(out, ref, rtol=5e-2, atol=5e-2), "mismatch vs JAX reference"

    print("KERNEL_OK")
</pallas_src>

<mosaic_0001>
module attributes {stable_mosaic.version = 11 : i64} {
  func.func @combined_kernel(%arg0: i32, %arg1: memref<8x16xf32, #tpu.memory_space<vmem>>, %arg2: memref<8x8xf32, #tpu.memory_space<vmem>>, %arg3: memref<16x32xbf16, #tpu.memory_space<vmem>>, %arg4: memref<1x32xf32, #tpu.memory_space<vmem>>, %arg5: memref<32x16xbf16, #tpu.memory_space<vmem>>, %arg6: memref<1x16xf32, #tpu.memory_space<vmem>>, %arg7: memref<8x32xbf16, #tpu.memory_space<vmem>>, %arg8: memref<1x32xf32, #tpu.memory_space<vmem>>, %arg9: memref<32x128xbf16, #tpu.memory_space<vmem>>, %arg10: memref<1x128xf32, #tpu.memory_space<vmem>>, %arg11: memref<8x128xf32, #tpu.memory_space<vmem>>) attributes {dimension_semantics = [#tpu.dimension_semantics<parallel>], iteration_bounds = array<i64: 1>, scalar_prefetch = 0 : i64, scratch_operands = 0 : i64, tpu.core_type = #tpu.core_type<tc>, window_params = [{transform_indices = @transform_0, window_bounds = array<i64: 8, 16>}, {transform_indices = @transform_1, window_bounds = array<i64: 8, 8>}, {pipeline_mode = #tpu.pipeline_mode<synchronous>, transform_indices = @transform_2, window_bounds = array<i64: 16, 32>}, {pipeline_mode = #tpu.pipeline_mode<synchronous>, transform_indices = @transform_3, window_bounds = array<i64: 1, 32>}, {pipeline_mode = #tpu.pipeline_mode<synchronous>, transform_indices = @transform_4, window_bounds = array<i64: 32, 16>}, {pipeline_mode = #tpu.pipeline_mode<synchronous>, transform_indices = @transform_5, window_bounds = array<i64: 1, 16>}, {pipeline_mode = #tpu.pipeline_mode<synchronous>, transform_indices = @transform_6, window_bounds = array<i64: 8, 32>}, {pipeline_mode = #tpu.pipeline_mode<synchronous>, transform_indices = @transform_7, window_bounds = array<i64: 1, 32>}, {pipeline_mode = #tpu.pipeline_mode<synchronous>, transform_indices = @transform_8, window_bounds = array<i64: 32, 128>}, {pipeline_mode = #tpu.pipeline_mode<synchronous>, transform_indices = @transform_9, window_bounds = array<i64: 1, 128>}, {transform_indices = @transform_10, window_bounds = array<i64: 8, 128>}]} {
    %c0 = arith.constant 0 : index
    %c0_0 = arith.constant 0 : index
    %0 = vector.load %arg1[%c0, %c0_0] : memref<8x16xf32, #tpu.memory_space<vmem>>, vector<8x16xf32>
    %1 = arith.truncf %0 : vector<8x16xf32> to vector<8x16xbf16>
    %c0_1 = arith.constant 0 : index
    %c0_2 = arith.constant 0 : index
    %2 = vector.load %arg3[%c0_1, %c0_2] : memref<16x32xbf16, #tpu.memory_space<vmem>>, vector<16x32xbf16>
    %cst = arith.constant dense<0.000000e+00> : vector<8x32xf32>
    %3 = tpu.matmul %1, %2, %cst {dimension_numbers = #tpu.dot_dimension_numbers<[1], [0], [0], [1], [0, 0, 1, 1], [], []>} : vector<8x16xbf16>, vector<16x32xbf16>, vector<8x32xf32> -> vector<8x32xf32>
    %c0_3 = arith.constant 0 : index
    %c0_4 = arith.constant 0 : index
    %4 = vector.load %arg4[%c0_3, %c0_4] : memref<1x32xf32, #tpu.memory_space<vmem>>, vector<1x32xf32>
    %5 = vector.broadcast %4 : vector<1x32xf32> to vector<8x32xf32>
    %6 = arith.addf %3, %5 : vector<8x32xf32>
    %cst_5 = arith.constant 0.000000e+00 : f32
    %7 = vector.broadcast %cst_5 : f32 to vector<8x32xf32>
    %8 = arith.maximumf %6, %7 : vector<8x32xf32>
    %9 = arith.truncf %8 : vector<8x32xf32> to vector<8x32xbf16>
    %c0_6 = arith.constant 0 : index
    %c0_7 = arith.constant 0 : index
    %10 = vector.load %arg5[%c0_6, %c0_7] : memref<32x16xbf16, #tpu.memory_space<vmem>>, vector<32x16xbf16>
    %cst_8 = arith.constant dense<0.000000e+00> : vector<8x16xf32>
    %11 = tpu.matmul %9, %10, %cst_8 {dimension_numbers = #tpu.dot_dimension_numbers<[1], [0], [0], [1], [0, 0, 1, 1], [], []>} : vector<8x32xbf16>, vector<32x16xbf16>, vector<8x16xf32> -> vector<8x16xf32>
    %c0_9 = arith.constant 0 : index
    %c0_10 = arith.constant 0 : index
    %12 = vector.load %arg6[%c0_9, %c0_10] : memref<1x16xf32, #tpu.memory_space<vmem>>, vector<1x16xf32>
    %13 = vector.broadcast %12 : vector<1x16xf32> to vector<8x16xf32>
    %14 = arith.addf %11, %13 : vector<8x16xf32>
    %15 = vector.extract_strided_slice %14 {offsets = [0, 0], sizes = [8, 8], strides = [1, 1]} : vector<8x16xf32> to vector<8x8xf32>
    %16 = vector.extract_strided_slice %14 {offsets = [0, 8], sizes = [8, 8], strides = [1, 1]} : vector<8x16xf32> to vector<8x8xf32>
    %cst_11 = arith.constant 5.000000e-01 : f32
    %17 = vector.broadcast %cst_11 : f32 to vector<8x8xf32>
    %18 = arith.mulf %17, %16 : vector<8x8xf32>
    %19 = math.exp %18 : vector<8x8xf32>
    %c0_12 = arith.constant 0 : index
    %c0_13 = arith.constant 0 : index
    %20 = vector.load %arg2[%c0_12, %c0_13] : memref<8x8xf32, #tpu.memory_space<vmem>>, vector<8x8xf32>
    %21 = arith.mulf %20, %19 : vector<8x8xf32>
    %22 = arith.addf %15, %21 : vector<8x8xf32>
    %23 = arith.truncf %22 : vector<8x8xf32> to vector<8x8xbf16>
    %c0_14 = arith.constant 0 : index
    %c0_15 = arith.constant 0 : index
    %24 = vector.load %arg7[%c0_14, %c0_15] : memref<8x32xbf16, #tpu.memory_space<vmem>>, vector<8x32xbf16>
    %cst_16 = arith.constant dense<0.000000e+00> : vector<8x32xf32>
    %25 = tpu.matmul %23, %24, %cst_16 {dimension_numbers = #tpu.dot_dimension_numbers<[1], [0], [0], [1], [0, 0, 1, 1], [], []>} : vector<8x8xbf16>, vector<8x32xbf16>, vector<8x32xf32> -> vector<8x32xf32>
    %c0_17 = arith.constant 0 : index
    %c0_18 = arith.constant 0 : index
    %26 = vector.load %arg8[%c0_17, %c0_18] : memref<1x32xf32, #tpu.memory_space<vmem>>, vector<1x32xf32>
    %27 = vector.broadcast %26 : vector<1x32xf32> to vector<8x32xf32>
    %28 = arith.addf %25, %27 : vector<8x32xf32>
    %cst_19 = arith.constant 0.000000e+00 : f32
    %29 = vector.broadcast %cst_19 : f32 to vector<8x32xf32>
    %30 = arith.maximumf %28, %29 : vector<8x32xf32>
    %31 = arith.truncf %30 : vector<8x32xf32> to vector<8x32xbf16>
    %c0_20 = arith.constant 0 : index
    %c0_21 = arith.constant 0 : index
    %32 = vector.load %arg9[%c0_20, %c0_21] : memref<32x128xbf16, #tpu.memory_space<vmem>>, vector<32x128xbf16>
    %cst_22 = arith.constant dense<0.000000e+00> : vector<8x128xf32>
    %33 = tpu.matmul %31, %32, %cst_22 {dimension_numbers = #tpu.dot_dimension_numbers<[1], [0], [0], [1], [0, 0, 1, 1], [], []>} : vector<8x32xbf16>, vector<32x128xbf16>, vector<8x128xf32> -> vector<8x128xf32>
    %c0_23 = arith.constant 0 : index
    %c0_24 = arith.constant 0 : index
    %34 = vector.load %arg10[%c0_23, %c0_24] : memref<1x128xf32, #tpu.memory_space<vmem>>, vector<1x128xf32>
    %35 = vector.broadcast %34 : vector<1x128xf32> to vector<8x128xf32>
    %36 = arith.addf %33, %35 : vector<8x128xf32>
    %c0_25 = arith.constant 0 : index
    %c0_26 = arith.constant 0 : index
    %37 = vector.load %arg11[%c0_25, %c0_26] : memref<8x128xf32, #tpu.memory_space<vmem>>, vector<8x128xf32>
    tpu.vector_store %arg11[%c0_25, %c0_26], %36 {strides = array<i32>} : memref<8x128xf32, #tpu.memory_space<vmem>>, vector<8x128xf32>,
    return
  }
  func.func @transform_0(%arg0: i32) -> (i32, i32) {
    %c0_i32 = arith.constant 0 : i32
    %c0_i32_0 = arith.constant 0 : i32
    return %arg0, %c0_i32 : i32, i32
  }
  func.func @transform_1(%arg0: i32) -> (i32, i32) {
    %c0_i32 = arith.constant 0 : i32
    %c0_i32_0 = arith.constant 0 : i32
    return %arg0, %c0_i32 : i32, i32
  }
  func.func @transform_2(%arg0: i32) -> (i32, i32) {
    %c0_i32 = arith.constant 0 : i32
    %c0_i32_0 = arith.constant 0 : i32
    %c0_i32_1 = arith.constant 0 : i32
    return %c0_i32, %c0_i32_0 : i32, i32
  }
  func.func @transform_3(%arg0: i32) -> (i32, i32) {
    %c0_i32 = arith.constant 0 : i32
    %c0_i32_0 = arith.constant 0 : i32
    %c0_i32_1 = arith.constant 0 : i32
    return %c0_i32, %c0_i32_0 : i32, i32
  }
  func.func @transform_4(%arg0: i32) -> (i32, i32) {
    %c0_i32 = arith.constant 0 : i32
    %c0_i32_0 = arith.constant 0 : i32
    %c0_i32_1 = arith.constant 0 : i32
    return %c0_i32, %c0_i32_0 : i32, i32
  }
  func.func @transform_5(%arg0: i32) -> (i32, i32) {
    %c0_i32 = arith.constant 0 : i32
    %c0_i32_0 = arith.constant 0 : i32
    %c0_i32_1 = arith.constant 0 : i32
    return %c0_i32, %c0_i32_0 : i32, i32
  }
  func.func @transform_6(%arg0: i32) -> (i32, i32) {
    %c0_i32 = arith.constant 0 : i32
    %c0_i32_0 = arith.constant 0 : i32
    %c0_i32_1 = arith.constant 0 : i32
    return %c0_i32, %c0_i32_0 : i32, i32
  }
  func.func @transform_7(%arg0: i32) -> (i32, i32) {
    %c0_i32 = arith.constant 0 : i32
    %c0_i32_0 = arith.constant 0 : i32
    %c0_i32_1 = arith.constant 0 : i32
    return %c0_i32, %c0_i32_0 : i32, i32
  }
  func.func @transform_8(%arg0: i32) -> (i32, i32) {
    %c0_i32 = arith.constant 0 : i32
    %c0_i32_0 = arith.constant 0 : i32
    %c0_i32_1 = arith.constant 0 : i32
    return %c0_i32, %c0_i32_0 : i32, i32
  }
  func.func @transform_9(%arg0: i32) -> (i32, i32) {
    %c0_i32 = arith.constant 0 : i32
    %c0_i32_0 = arith.constant 0 : i32
    %c0_i32_1 = arith.constant 0 : i32
    return %c0_i32, %c0_i32_0 : i32, i32
  }
  func.func @transform_10(%arg0: i32) -> (i32, i32) {
    %c0_i32 = arith.constant 0 : i32
    %c0_i32_0 = arith.constant 0 : i32
    return %arg0, %c0_i32 : i32, i32
  }
}

</mosaic_0001>

<bundles_post_ra>
// kernel: tpu_custom_call.1
= control target key start
LH: loop header
LB: loop body
LE: loop exit
PB: predicated region body
PF: predicated region fallthrough
CT: control target
= control target key end

     0   :  { %15 = vsyncpa [#allocation3], 0  ;;  %s625_s0 = inlined_call_operand.vmem [shape: f32[8,16], index: 0, kind: input, shape index: {}]   ;;  %s626_s1 = inlined_call_operand.hbm [shape: f32[8,8], index: 1, kind: input, shape index: {}]   ;;  %s627_s2 = inlined_call_operand.hbm [shape: bf16[16,32], index: 2, kind: input, shape index: {}]   ;;  %s628_s3 = inlined_call_operand.vmem [shape: f32[1,32], index: 3, kind: input, shape index: {}]   ;;  %s629_s4 = inlined_call_operand.vmem [shape: bf16[32,16], index: 4, kind: input, shape index: {}]   ;;  %s630_s5 = inlined_call_operand.vmem [shape: f32[1,16], index: 5, kind: input, shape index: {}]   ;;  %s631_s6 = inlined_call_operand.vmem [shape: bf16[8,32], index: 6, kind: input, shape index: {}]   ;;  %s632_s7 = inlined_call_operand.vmem [shape: f32[1,32], index: 7, kind: input, shape index: {}]   ;;  %s633_s8 = inlined_call_operand.vmem [shape: bf16[32,128], index: 8, kind: input, shape index: {}]   ;;  %s634_s9 = inlined_call_operand.vmem [shape: f32[1,128], index: 9, kind: input, shape index: {}]   ;;  %s635_s10 = inlined_call_operand.hbm [shape: f32[8,128], index: 10, kind: output, shape index: {}]  }
   0x1   :  { %16 = vsyncpa [#allocation6], 0 }
   0x2   :  { %17 = vsyncpa [#allocation4], 0  ;;  %s483_s13 = smov [#allocation2]   ;;  %s484_s15 = smov [#allocation5]  }
   0x3   :  { %s26_s14 = sshll.u32 %s483_s13, 4  ;;  %s35_s16 = sshll.u32 %s484_s15, 4  ;;  %s27_s14 = int_to_ptr.vmem [resolvable:$true] %s26_s14  ;;  %s546_s16 = int_to_ptr.vmem [resolvable:$true] %s35_s16 }
   0x4   :  { %s411_s19 = scalar_lea.hbm %s626_s1, 128 }
   0x5   :  { %p412_p0 = scmp.ne.s32.totalorder %s626_s1, %s411_s19  ;;  %p415_p1 = scmp.lt.u32.totalorder %s411_s19, %s626_s1 }
   0x7   :  { %p417_p2 = pnand %p415_p1, %p412_p0 }
   0x9   :  { %420 = shalt.err (!%p417_p2)
}
   0xa   :  { %s421_s24 = scalar_lea.vmem %s27_s14, 128  ;;  %p426_p4 = scmp.lt.s32.totalorder %s27_s14, %s27_s14 }
   0xb   :  { %p422_p3 = scmp.ne.s32.totalorder %s27_s14, %s421_s24  ;;  %p427_p5 = scmp.lt.s32.totalorder %s421_s24, %s421_s24 }
   0xd   :  { %p428_p6 = por %p427_p5, %p426_p4 }
   0xf   :  { %p429_p7 = pnand %p428_p6, %p422_p3 }
  0x11   :  { %432 = shalt.err (!%p429_p7)
}
  0x12   :  { %29 = dma.hbm_to_vmem [thread:$0]  %s626_s1, 128, %s27_s14, [#allocation3]  }
  0x13   :  { %s433_s29 = scalar_lea.hbm %s627_s2, 128 }
  0x14   :  { %p434_p8 = scmp.ne.s32.totalorder %s627_s2, %s433_s29  ;;  %p437_p9 = scmp.lt.u32.totalorder %s433_s29, %s627_s2 }
  0x16   :  { %p439_p10 = pnand %p437_p9, %p434_p8 }
  0x18   :  { %442 = shalt.err (!%p439_p10)
}
  0x19   :  { %s443_s15 = scalar_lea.vmem %s546_s16, 128  ;;  %p448_p12 = scmp.lt.s32.totalorder %s546_s16, %s546_s16 }
  0x1a   :  { %p444_p11 = scmp.ne.s32.totalorder %s546_s16, %s443_s15  ;;  %p449_p13 = scmp.lt.s32.totalorder %s443_s15, %s443_s15 }
  0x1c   :  { %p450_p0 = por %p449_p13, %p448_p12 }
  0x1e   :  { %p451_p1 = pnand %p450_p0, %p444_p11 }
  0x20   :  { %454 = shalt.err (!%p451_p1)
}
  0x21   :  { %s485_s1 = smov 64   ;;  %s486_s14 = smov 4  }
  0x22   :  { %41 = dma.hbm_to_vmem [thread:$0]  %s627_s2, 128, %s546_s16, [#allocation6], %s485_s1, %s485_s1, %s486_s14  }
  0x23   :  { %477 = dma.done.wait [#allocation3], 128  }
  0x24   :  { %478 = vsyncadd [#allocation3], 4294967168 }
  0x25   :  { %479 = dma.done.wait [#allocation6], 128  }
  0x26   :  { %480 = vsyncadd [#allocation6], 4294967168  ;;  %v487_v0 = vmov 0.0   ;;  %vm488_vm0 = vmmov 0   ;;  %v404_v1 = vld [vmem:[#allocation5] sm:$0xff]   ;;  %v63_v2 = vld [vmem:[%s625_s0] sm:$0xff] }
  0x27   :  { %368 = vmatprep.subr.bf16.mxu0 %v487_v0  ;;  %370 = vmatprep.mubr.msk.bf16.mxu0 %vm488_vm0, %v487_v0  ;;  %vm80_vm1 = vcmask 130048   ;;  %v64_v3 = vpack.c.bf16 %v63_v2, %v63_v2  ;;  %v405_v4 = vld [vmem:[%s629_s4] sm:$0xff]   ;;  %v406_v5 = vld [vmem:[%s629_s4 + $0x8] sm:$0xff]   ;;  %vm149_vm2 = vcmask 261120   ;;  %vm216_vm3 = vcmask 1043456   ;;  %s490_s13 = smov [#allocation7]  }
  0x28   :  { %374 = vmatprep.subr.bf16.mxu1 %v487_v0  ;;  %378 = vmatprep.mubr.msk.bf16.mxu1 %vm488_vm0, %v487_v0  ;;  %v345_v6 = vld [vmem:[%s628_s3] ss:$0 sm:$0xff]  ;;  %vm212_vm4 = vcmask 64512   ;;  %v408_v31 = vld [vmem:[%s633_s8 + $0x8] sm:$0xff]  }
  0x29   :  { %369 = vmatpush3.bf16.msra.mxu0 %v404_v1  ;;  %375 = vmatpush3.bf16.msra.mxu1 %v405_v4  ;;  %v204_v14 = vld [vmem:[%s631_s6] sm:$0xf]  ;;  %s489_s6 = smov 120  }
  0x2a   :  { %382 = vmatprep.subr.bf16.mxu0 %v487_v0  ;;  %376 = vmatprep.subr.bf16.mxu1 %v487_v0  ;;  %v218_v15 = vsel %vm216_vm3, %v204_v14, 0  ;;  %v348_v16 = vld [vmem:[%s630_s5] ss:$0 sm:$0xff] }
  0x2b   :  { %v407_v24 = vld [vmem:[%s633_s8] sm:$0xff]   ;;  %s335_s8 = sshll.u32 %s490_s13, 4  ;;  %s336_s8 = int_to_ptr.vmem [resolvable:$true] %s335_s8 }
  0x2c   :  { %371 = vmatmul.mubr.msk.bf16.vlgmr.msra.gmra.mrb[0].mxu0 %vm80_vm1, %v64_v3  ;;  %v196_v26 = vld [vmem:[#allocation2] sm:$0xff]  ;;  %p460_p3 = scmp.lt.s32.totalorder %s336_s8, %s336_s8 }
  0x2d   :  { %384 = vmatprep.mubr.msk.bf16.mxu0 %vm488_vm0, %v487_v0  ;;  %377 = vmatpush3.bf16.msra.mxu1 %v406_v5  ;;  %v352_v32 = vld [vmem:[%s632_s7] ss:$0 sm:$0xff]  ;;  %s455_s7 = scalar_lea.vmem %s336_s8, 128 }
  0x2e   :  { %388 = vmatprep.subr.bf16.mxu1 %v487_v0  ;;  %383 = vmatpush3.bf16.msra.mxu0 %v218_v15  ;;  %v354_v40 = vld [vmem:[%s634_s9] ss:$0 sm:$0xff]  ;;  %p456_p2 = scmp.ne.s32.totalorder %s336_s8, %s455_s7  ;;  %p461_p4 = scmp.lt.s32.totalorder %s455_s7, %s455_s7 }
  0x30   :  { %p462_p5 = por %p461_p4, %p460_p3 }
  0x32   :  { %p463_p6 = pnand %p462_p5, %p456_p2 }
  0xff   :  { %v118_v7 = vpop.f32.mrb[0].mxu0 }
 0x100   :  { %v119_v8 = vadd.f32 %v345_v6, %v118_v7  ;;  %v372_v9 = vpop.f32.mrb[1].mxu0 }
 0x101   :  { %v121_v10 = vpop.f32.mrb[2].mxu0 }
 0x102   :  { %v124_v11 = vmax.f32 %v119_v8, 0.0  ;;  %v373_v12 = vpop.f32.mrb[3].mxu0 }
 0x104   :  { %v125_v13 = vpack.c.bf16 %v124_v11, %v124_v11 }
 0x106   :  { %379 = vmatmul.mubr.msk.bf16.vlgmr.msra.gmra.mrb[0].mxu1 %vm149_vm2, %v125_v13 }
 0x107   :  { %392 = vmatprep.mubr.msk.bf16.mxu1 %vm488_vm0, %v487_v0  ;;  %389 = vmatpush3.bf16.msra.mxu1 %v407_v24 }
 0x108   :  { %390 = vmatprep.subr.bf16.mxu1 %v487_v0 }
 0x10b   :  { %391 = vmatpush3.bf16.msra.mxu1 %v408_v31 }
 0x1d9   :  { %v187_v17 = vpop.f32.mrb[0].mxu1 }
 0x1da   :  { %v188_v18 = vadd.f32 %v348_v16, %v187_v17  ;;  %v380_v19 = vpop.f32.mrb[1].mxu1 }
 0x1db   :  { %v190_v20 = vpop.f32.mrb[2].mxu1 }
 0x1dc   :  { %v193_v21 = vmul.f32 0.5, %v188_v18  ;;  %v381_v22 = vpop.f32.mrb[3].mxu1 }
 0x1de   :  { %v194_v23 = vmul.f32 1.442695, %v193_v21 }
 0x1e0   :  { %409 = vpow2.f32 %v194_v23 }
 0x1ea   :  { %v410_v25 = vpop.eup %409 }
 0x1eb   :  { %198 = vrot.lane.b32.xlu0 %v410_v25, %s489_s6 }
 0x25d   :  { %v199_v27 = vpop.permute.xlu0 %198 }
 0x25e   :  { %v201_v28 = vmul.f32 %v199_v27, %v196_v26 }
 0x260   :  { %v202_v29 = vadd.f32 %v201_v28, %v188_v18 }
 0x262   :  { %v203_v30 = vpack.c.bf16 %v202_v29, %v202_v29 }
 0x264   :  { %385 = vmatmul.mubr.msk.bf16.vlgmr.msra.gmra.mrb[4].mxu0 %vm212_vm4, %v203_v30 }
 0x337   :  { %v254_v33 = vpop.f32.mrb[4].mxu0 }
 0x338   :  { %v255_v34 = vadd.f32 %v352_v32, %v254_v33  ;;  %v386_v35 = vpop.f32.mrb[5].mxu0 }
 0x339   :  { %v257_v36 = vpop.f32.mrb[6].mxu0 }
 0x33a   :  { %v260_v37 = vmax.f32 %v255_v34, 0.0  ;;  %v387_v38 = vpop.f32.mrb[7].mxu0 }
 0x33c   :  { %v261_v39 = vpack.c.bf16 %v260_v37, %v260_v37 }
 0x33e   :  { %393 = vmatmul.mubr.msk.bf16.vlgmr.msra.gmra.mrb[4].mxu1 %vm149_vm2, %v261_v39 }
 0x411   :  { %v322_v41 = vpop.f32.mrb[4].mxu1 }
 0x412   :  { %v323_v42 = vadd.f32 %v354_v40, %v322_v41  ;;  %v394_v43 = vpop.f32.mrb[5].mxu1 }
 0x413   :  { %v325_v44 = vpop.f32.mrb[6].mxu1 }
 0x414   :  { %328 = vst [vmem:[#allocation7] sm:$0xff] %v323_v42  ;;  %v395_v45 = vpop.f32.mrb[7].mxu1 }
 0x415   :  { %466 = shalt.err (!%p463_p6)
}
 0x416   :  { %s467_s9 = scalar_lea.hbm %s635_s10, 128 }
 0x417   :  { %p468_p7 = scmp.ne.s32.totalorder %s635_s10, %s467_s9  ;;  %p471_p8 = scmp.lt.u32.totalorder %s467_s9, %s635_s10 }
 0x419   :  { %p473_p9 = pnand %p471_p8, %p468_p7 }
 0x41b   :  { %476 = shalt.err (!%p473_p9)
}
 0x41c   :  { %338 = dma.vmem_to_hbm [thread:$0]  %s336_s8, 128, %s635_s10, [#allocation4]  }
 0x41d   :  { %481 = dma.done.wait [#allocation4], 128  }
 0x41e   :  { %482 = vsyncadd [#allocation4], 4294967168 }
 0x41f   :  { %342 = vsyncpa [#allocation3], 1 }
 0x420   :  { %343 = vsyncpa [#allocation6], 1 }
 0x421   :  { %344 = vsyncpa [#allocation4], 1 }

</bundles_post_ra>
